<compile_context>
chip_gen: v7x
topology: tpu7x:2x2x1
jax: 0.10.0
libtpu: 0.0.40
codegen_flags: <defaults>
</compile_context>

<pallas_src>
import functools
import math

import jax
import jax.numpy as jnp
from jax import lax
from jax.experimental import pallas as pl
from jax.experimental.pallas import tpu as pltpu

# Keep the f32 logit path bit-consistent between kernels and the pure-JAX reference.
jax.config.update("jax_default_matmul_precision", "highest")

NEG_SLOPE = 0.01            # torch F.leaky_relu default negative slope
MASK_VAL = float("-inf")    # additive mask for non-edges (bf16 -inf)
M_INIT = -1e30              # finite init for the running max (keeps exp() NaN-free)


def _round_up(a, b):
    return (a + b - 1) // b * b


def _proj_kernel(x_ref, w_ref, asrc_ref, adst_ref, z_ref, s_ref, d_ref):
    """Per (row-tile, head): z = x @ W_h^T (bf16, head-major layout), plus per-node logit
    projections s = z.a_src (node index on lanes) and d = z.a_dst (node index on sublanes),
    so the attention kernel loads them directly without transposes or recompute."""
    x = x_ref[...]                                                     # (TI, in)  f32
    z = jnp.dot(x, w_ref[0], preferred_element_type=jnp.float32)      # (TI, D)   f32
    z_ref[0] = z.astype(z_ref.dtype)                                  # bf16 for p @ z MXU path
    # s: (1, D) x (TI, D)^T on the MXU -> (1, TI), node on lanes.
    s_ref[0] = lax.dot_general(asrc_ref[0], z, (((1,), (1,)), ((), ())),
                               preferred_element_type=jnp.float32)
    # d: (TI, D) x (1, D)^T on the MXU -> (TI, 1), node on sublanes.
    d_ref[0] = lax.dot_general(z, adst_ref[0], (((1,), (1,)), ((), ())),
                               preferred_element_type=jnp.float32)


def _attn_kernel(nz_ref, s_ref, d_ref, z_ref, mask_ref, out_ref,
                 m_sc, l_sc, acc_sc, *, inv_heads):
    """grid = (dst tiles 'parallel', src tiles, heads innermost).  Flash-style online
    softmax over the source axis; per-head running stats live in VMEM scratch; the output
    block stays resident across (src, head) and accumulates the mean over heads."""
    j = pl.program_id(0)
    k = pl.program_id(1)
    h = pl.program_id(2)
    nk = pl.num_programs(1)

    @pl.when(k == 0)
    def _init():
        m_sc[h] = jnp.full(m_sc.shape[1:], M_INIT, jnp.float32)
        l_sc[h] = jnp.zeros(l_sc.shape[1:], jnp.float32)
        acc_sc[h] = jnp.zeros(acc_sc.shape[1:], jnp.float32)

    # Block-sparse skip: (dst, src) tiles with no edges contribute nothing; skipping them
    # saves the exp/leaky/select work (EUP/VPU are the narrow slots for the dense math).
    @pl.when(nz_ref[j, k] > 0)
    def _attend():
        s_row = s_ref[0]                          # (1, TK)  f32  source logit projection
        d_col = d_ref[0]                          # (TJ, 1)  f32  destination logit projection
        e = d_col + s_row                         # (TJ, TK) f32
        e = jnp.maximum(e, NEG_SLOPE * e)         # leaky_relu, max form (2 VPU ops)
        e = e + mask_ref[...].astype(jnp.float32)  # additive adjacency mask: 0 / -inf

        m_prev = m_sc[h]
        m_new = jnp.maximum(m_prev, jnp.max(e, axis=-1, keepdims=True))
        alpha = jnp.exp(m_prev - m_new)
        p = jnp.exp(e - m_new)                    # masked entries -> exactly 0
        l_sc[h] = alpha * l_sc[h] + jnp.sum(p, axis=-1, keepdims=True)
        acc_sc[h] = alpha * acc_sc[h] + jnp.dot(
            p.astype(jnp.bfloat16), z_ref[0], preferred_element_type=jnp.float32)
        m_sc[h] = m_new

    @pl.when(k == nk - 1)
    def _finalize():
        l = l_sc[h]
        acc = acc_sc[h]
        # Exact reciprocal (approx EUP rcp adds ~1e-3 relative error to the softmax).
        inv = 1.0 / jnp.where(l > 0.0, l, 1.0)    # l == 0 -> zero in-degree -> acc == 0 -> out 0
        u = acc * inv
        hh = jnp.where(u > 0.0, u, jnp.expm1(u)) * inv_heads   # ELU(alpha=1), head mean

        @pl.when(h == 0)
        def _():
            out_ref[...] = hh

        @pl.when(h > 0)
        def _():
            out_ref[...] = out_ref[...] + hh


def gat_layer(x, adj, w, a_src, a_dst, *, tile_j=128, tile_k=256, tile_i=256):
    """x: (N, in_dim) f32; adj: (N, N) with adj[i, j] != 0 iff edge i -> j;
    w: (H, out_dim, in_dim) (torch Linear layout); a_src, a_dst: (H, 1, out_dim)."""
    N, in_dim = x.shape
    H, out_dim, _ = w.shape

    # Lane-mapped axes (source / projection rows) need multiples of 128; the dst (sublane)
    # tile needs a multiple of 16 for bf16 mask packing.
    n128 = _round_up(N, 128)
    tk = min(_round_up(tile_k, 128), n128)
    ti = min(_round_up(tile_i, 128), n128)
    tj = min(_round_up(tile_j, 16), n128)
    n_pad = _round_up(N, math.lcm(ti, tj, tk))
    n_i, n_j, n_k = n_pad // ti, n_pad // tj, n_pad // tk

    x_pad = jnp.pad(x.astype(jnp.float32), ((0, n_pad - N), (0, 0)))
    adj_t = jnp.pad(adj, ((0, n_pad - N), (0, n_pad - N))).T        # [dst, src]
    edge = adj_t > 0
    # Additive mask in bf16: halves the only N^2 HBM stream vs f32 (0 / -inf exact in bf16).
    mask = jnp.where(edge, 0.0, MASK_VAL).astype(jnp.bfloat16)
    # Per-(dst-tile, src-tile) occupancy table for block-sparse skipping (scalar prefetch).
    nz = edge.reshape(n_j, tj, n_k, tk).any(axis=(1, 3)).astype(jnp.int32)

    # ---- fused projection: z (head-major bf16) + per-node logit projections s, d ----
    w_t = jnp.transpose(w, (0, 2, 1)).astype(jnp.float32)           # (H, in, D), tiny
    z_heads, s_all, d_all = pl.pallas_call(
        _proj_kernel,
        out_shape=(
            jax.ShapeDtypeStruct((H, n_pad, out_dim), jnp.bfloat16),   # z, head-major
            jax.ShapeDtypeStruct((H, 1, n_pad), jnp.float32),          # s, node on lanes
            jax.ShapeDtypeStruct((H, n_pad, 1), jnp.float32),          # d, node on sublanes
        ),
        grid_spec=pltpu.PrefetchScalarGridSpec(
            num_scalar_prefetch=0,
            grid=(n_i, H),
            in_specs=[
                pl.BlockSpec((ti, in_dim), lambda i, h: (i, 0)),
                pl.BlockSpec((1, in_dim, out_dim), lambda i, h: (h, 0, 0)),
                pl.BlockSpec((1, 1, out_dim), lambda i, h: (h, 0, 0)),
                pl.BlockSpec((1, 1, out_dim), lambda i, h: (h, 0, 0)),
            ],
            out_specs=[
                pl.BlockSpec((1, ti, out_dim), lambda i, h: (h, i, 0)),
                pl.BlockSpec((1, 1, ti), lambda i, h: (h, 0, i)),
                pl.BlockSpec((1, ti, 1), lambda i, h: (h, i, 0)),
            ],
        ),
        compiler_params=pltpu.CompilerParams(
            dimension_semantics=("parallel", "parallel")),
    )(x_pad, w_t, a_src.astype(jnp.float32), a_dst.astype(jnp.float32))

    # ---- attention: flash-style online softmax over source tiles ----
    kernel = functools.partial(_attn_kernel, inv_heads=1.0 / H)
    out = pl.pallas_call(
        kernel,
        out_shape=jax.ShapeDtypeStruct((n_pad, out_dim), jnp.float32),
        grid_spec=pltpu.PrefetchScalarGridSpec(
            num_scalar_prefetch=1,                   # nz occupancy table -> SMEM
            grid=(n_j, n_k, H),                      # heads innermost: mask tile reused across H
            in_specs=[
                pl.BlockSpec((1, 1, tk), lambda j, k, h, nz: (h, 0, k)),        # s (src row)
                pl.BlockSpec((1, tj, 1), lambda j, k, h, nz: (h, j, 0)),        # d (dst col)
                pl.BlockSpec((1, tk, out_dim), lambda j, k, h, nz: (h, k, 0)),  # z src tile (bf16)
                pl.BlockSpec((tj, tk), lambda j, k, h, nz: (j, k)),             # additive mask
            ],
            out_specs=pl.BlockSpec((tj, out_dim), lambda j, k, h, nz: (j, 0)),
            scratch_shapes=[
                pltpu.VMEM((H, tj, 1), jnp.float32),        # running max
                pltpu.VMEM((H, tj, 1), jnp.float32),        # running denom
                pltpu.VMEM((H, tj, out_dim), jnp.float32),  # running numerator
            ],
        ),
        compiler_params=pltpu.CompilerParams(
            dimension_semantics=("parallel", "arbitrary", "arbitrary"),
            vmem_limit_bytes=32 * 1024 * 1024,       # re-derived for v7x's 64 MiB/TC
        ),
    )(nz, s_all, d_all, z_heads, mask)

    return out[:N]


def gat_ref(x, adj, w, a_src, a_dst):
    """Pure-JAX reference (mirrors the DGL/PyTorch forward; 0-in-degree nodes -> 0)."""
    mask = adj.T > 0
    has_edge = mask.any(axis=-1, keepdims=True)
    outs = []
    for h in range(w.shape[0]):
        z = x @ w[h].T
        s = z @ a_src[h, 0]
        d = z @ a_dst[h, 0]
        e = d[:, None] + s[None, :]
        e = jnp.where(e >= 0, e, NEG_SLOPE * e)
        e = jnp.where(mask, e, -jnp.inf)
        att = jax.nn.softmax(e, axis=-1)
        att = jnp.where(mask, att, 0.0)
        hh = jax.nn.elu(att @ z)
        hh = jnp.where(has_edge, hh, 0.0)
        outs.append(hh)
    return jnp.mean(jnp.stack(outs), axis=0)


if __name__ == "__main__":
    key = jax.random.PRNGKey(0)
    N, in_dim, out_dim, num_heads = 96, 16, 32, 2

    k_x, k_w, k_a = jax.random.split(key, 3)
    x = jax.random.normal(k_x, (N, in_dim), dtype=jnp.float32)

    # Deterministic xavier_normal-style init (gain for leaky_relu, as in reset_parameters).
    gain = math.sqrt(2.0 / (1.0 + NEG_SLOPE ** 2))
    std_fc = gain * math.sqrt(2.0 / (in_dim + out_dim))
    std_att = gain * math.sqrt(2.0 / (2 * out_dim + 1))
    w = jax.random.normal(k_w, (num_heads, out_dim, in_dim), dtype=jnp.float32) * std_fc
    attn_w = jax.random.normal(k_a, (num_heads, 2 * out_dim), dtype=jnp.float32) * std_att
    a_src = attn_w[:, :out_dim].reshape(num_heads, 1, out_dim)   # weight on src half of cat
    a_dst = attn_w[:, out_dim:].reshape(num_heads, 1, out_dim)   # weight on dst half of cat

    # Deterministic directed graph: each node i has edges i->(i+1)%N and i->(i+3)%N.
    adj = jnp.zeros((N, N), dtype=jnp.float32)
    idx = jnp.arange(N)
    adj = adj.at[idx, (idx + 1) % N].set(1.0)
    adj = adj.at[idx, (idx + 3) % N].set(1.0)

    # N padded to 128; tile_j=64 -> 2 dst tiles (keeps both v7x TensorCores busy).
    out = gat_layer(x, adj, w, a_src, a_dst, tile_j=64, tile_k=128, tile_i=128)
    out = jax.block_until_ready(out)

    ref = gat_ref(x, adj, w, a_src, a_dst)
    assert out.shape == (N, out_dim)
    # Logits / softmax / accumulation are full f32; the only reduced-precision path is the
    # deliberate bf16 z & p feeding the aggregation MXU matmul (~<=1e-2 max-abs effect).
    max_diff = float(jnp.max(jnp.abs(out - ref)))
    assert jnp.allclose(out, ref, rtol=2e-2, atol=2e-2), f"mismatch vs reference ({max_diff})"

    print("KERNEL_OK")
</pallas_src>

<mosaic_0001>
module attributes {stable_mosaic.version = 11 : i64} {
  func.func @_proj_kernel(%arg0: i32, %arg1: i32, %arg2: memref<128x16xf32, #tpu.memory_space<vmem>>, %arg3: memref<1x16x32xf32, #tpu.memory_space<vmem>>, %arg4: memref<1x1x32xf32, #tpu.memory_space<vmem>>, %arg5: memref<1x1x32xf32, #tpu.memory_space<vmem>>, %arg6: memref<1x128x32xbf16, #tpu.memory_space<vmem>>, %arg7: memref<1x1x128xf32, #tpu.memory_space<vmem>>, %arg8: memref<1x128x1xf32, #tpu.memory_space<vmem>>) attributes {dimension_semantics = [#tpu.dimension_semantics<parallel>, #tpu.dimension_semantics<parallel>], iteration_bounds = array<i64: 1, 2>, scalar_prefetch = 0 : i64, scratch_operands = 0 : i64, tpu.core_type = #tpu.core_type<tc>, window_params = [{transform_indices = @transform_0, window_bounds = array<i64: 128, 16>}, {transform_indices = @transform_1, window_bounds = array<i64: 1, 16, 32>}, {transform_indices = @transform_2, window_bounds = array<i64: 1, 1, 32>}, {transform_indices = @transform_3, window_bounds = array<i64: 1, 1, 32>}, {transform_indices = @transform_4, window_bounds = array<i64: 1, 128, 32>}, {transform_indices = @transform_5, window_bounds = array<i64: 1, 1, 128>}, {transform_indices = @transform_6, window_bounds = array<i64: 1, 128, 1>}]} {
    %c0 = arith.constant 0 : index
    %c0_0 = arith.constant 0 : index
    %0 = vector.load %arg2[%c0, %c0_0] : memref<128x16xf32, #tpu.memory_space<vmem>>, vector<128x16xf32>
    %c0_1 = arith.constant 0 : index
    %c0_2 = arith.constant 0 : index
    %c0_3 = arith.constant 0 : index
    %1 = vector.load %arg3[%c0_1, %c0_2, %c0_3] : memref<1x16x32xf32, #tpu.memory_space<vmem>>, vector<1x16x32xf32>
    %2 = vector.shape_cast %1 : vector<1x16x32xf32> to vector<16x32xf32>
    %cst = arith.constant dense<0.000000e+00> : vector<128x32xf32>
    %3 = tpu.matmul %0, %2, %cst {dimension_numbers = #tpu.dot_dimension_numbers<[1], [0], [0], [1], [0, 0, 1, 1], [], []>, precision = #tpu.contract_precision<fp32>} : vector<128x16xf32>, vector<16x32xf32>, vector<128x32xf32> -> vector<128x32xf32>
    %4 = arith.truncf %3 : vector<128x32xf32> to vector<128x32xbf16>
    %c0_4 = arith.constant 0 : index
    %c0_5 = arith.constant 0 : index
    %c0_6 = arith.constant 0 : index
    %5 = vector.load %arg6[%c0_4, %c0_5, %c0_6] : memref<1x128x32xbf16, #tpu.memory_space<vmem>>, vector<1x128x32xbf16>
    %6 = vector.shape_cast %5 : vector<1x128x32xbf16> to vector<128x32xbf16>
    %7 = vector.shape_cast %4 : vector<128x32xbf16> to vector<1x128x32xbf16>
    tpu.vector_store %arg6[%c0_4, %c0_5, %c0_6], %7 {strides = array<i32>} : memref<1x128x32xbf16, #tpu.memory_space<vmem>>, vector<1x128x32xbf16>,
    %c0_7 = arith.constant 0 : index
    %c0_8 = arith.constant 0 : index
    %c0_9 = arith.constant 0 : index
    %8 = vector.load %arg4[%c0_7, %c0_8, %c0_9] : memref<1x1x32xf32, #tpu.memory_space<vmem>>, vector<1x1x32xf32>
    %9 = vector.shape_cast %8 : vector<1x1x32xf32> to vector<1x32xf32>
    %cst_10 = arith.constant dense<0.000000e+00> : vector<1x128xf32>
    %10 = tpu.matmul %9, %3, %cst_10 {dimension_numbers = #tpu.dot_dimension_numbers<[1], [1], [0], [0], [0, 0, 1, 0], [], []>, precision = #tpu.contract_precision<fp32>} : vector<1x32xf32>, vector<128x32xf32>, vector<1x128xf32> -> vector<1x128xf32>
    %c0_11 = arith.constant 0 : index
    %c0_12 = arith.constant 0 : index
    %c0_13 = arith.constant 0 : index
    %11 = vector.load %arg7[%c0_11, %c0_12, %c0_13] : memref<1x1x128xf32, #tpu.memory_space<vmem>>, vector<1x1x128xf32>
    %12 = vector.shape_cast %11 : vector<1x1x128xf32> to vector<1x128xf32>
    %13 = vector.shape_cast %10 : vector<1x128xf32> to vector<1x1x128xf32>
    tpu.vector_store %arg7[%c0_11, %c0_12, %c0_13], %13 {strides = array<i32>} : memref<1x1x128xf32, #tpu.memory_space<vmem>>, vector<1x1x128xf32>,
    %c0_14 = arith.constant 0 : index
    %c0_15 = arith.constant 0 : index
    %c0_16 = arith.constant 0 : index
    %14 = vector.load %arg5[%c0_14, %c0_15, %c0_16] : memref<1x1x32xf32, #tpu.memory_space<vmem>>, vector<1x1x32xf32>
    %15 = vector.shape_cast %14 : vector<1x1x32xf32> to vector<1x32xf32>
    %cst_17 = arith.constant dense<0.000000e+00> : vector<128x1xf32>
    %16 = tpu.matmul %3, %15, %cst_17 {dimension_numbers = #tpu.dot_dimension_numbers<[1], [1], [0], [0], [0, 0, 1, 0], [], []>, precision = #tpu.contract_precision<fp32>} : vector<128x32xf32>, vector<1x32xf32>, vector<128x1xf32> -> vector<128x1xf32>
    %c0_18 = arith.constant 0 : index
    %c0_19 = arith.constant 0 : index
    %c0_20 = arith.constant 0 : index
    %17 = vector.load %arg8[%c0_18, %c0_19, %c0_20] : memref<1x128x1xf32, #tpu.memory_space<vmem>>, vector<1x128x1xf32>
    %18 = vector.shape_cast %17 : vector<1x128x1xf32> to vector<128x1xf32>
    %19 = vector.shape_cast %16 : vector<128x1xf32> to vector<1x128x1xf32>
    tpu.vector_store %arg8[%c0_18, %c0_19, %c0_20], %19 {strides = array<i32>} : memref<1x128x1xf32, #tpu.memory_space<vmem>>, vector<1x128x1xf32>,
    return
  }
  func.func @transform_0(%arg0: i32, %arg1: i32) -> (i32, i32) {
    %c0_i32 = arith.constant 0 : i32
    %c0_i32_0 = arith.constant 0 : i32
    return %arg0, %c0_i32 : i32, i32
  }
  func.func @transform_1(%arg0: i32, %arg1: i32) -> (i32, i32, i32) {
    %c0_i32 = arith.constant 0 : i32
    %c0_i32_0 = arith.constant 0 : i32
    %c0_i32_1 = arith.constant 0 : i32
    return %arg1, %c0_i32, %c0_i32_0 : i32, i32, i32
  }
  func.func @transform_2(%arg0: i32, %arg1: i32) -> (i32, i32, i32) {
    %c0_i32 = arith.constant 0 : i32
    %c0_i32_0 = arith.constant 0 : i32
    %c0_i32_1 = arith.constant 0 : i32
    return %arg1, %c0_i32, %c0_i32_0 : i32, i32, i32
  }
  func.func @transform_3(%arg0: i32, %arg1: i32) -> (i32, i32, i32) {
    %c0_i32 = arith.constant 0 : i32
    %c0_i32_0 = arith.constant 0 : i32
    %c0_i32_1 = arith.constant 0 : i32
    return %arg1, %c0_i32, %c0_i32_0 : i32, i32, i32
  }
  func.func @transform_4(%arg0: i32, %arg1: i32) -> (i32, i32, i32) {
    %c0_i32 = arith.constant 0 : i32
    %c0_i32_0 = arith.constant 0 : i32
    return %arg1, %arg0, %c0_i32 : i32, i32, i32
  }
  func.func @transform_5(%arg0: i32, %arg1: i32) -> (i32, i32, i32) {
    %c0_i32 = arith.constant 0 : i32
    %c0_i32_0 = arith.constant 0 : i32
    return %arg1, %c0_i32, %arg0 : i32, i32, i32
  }
  func.func @transform_6(%arg0: i32, %arg1: i32) -> (i32, i32, i32) {
    %c0_i32 = arith.constant 0 : i32
    %c0_i32_0 = arith.constant 0 : i32
    return %arg1, %arg0, %c0_i32 : i32, i32, i32
  }
}

</mosaic_0001>

<bundles_post_ra>
// kernel: tpu_custom_call.1
= control target key start
LH: loop header
LB: loop body
LE: loop exit
PB: predicated region body
PF: predicated region fallthrough
CT: control target
= control target key end

     0   :  { %12 = vsyncpa [#allocation3], 0  ;;  %s4610_s0 = inlined_call_operand.vmem [shape: f32[128,16], index: 0, kind: input, shape index: {}]   ;;  %s4611_s1 = inlined_call_operand.vmem [shape: f32[2,16,32], index: 1, kind: input, shape index: {}]   ;;  %s4612_s2 = inlined_call_operand.vmem [shape: f32[2,1,32], index: 2, kind: input, shape index: {}]   ;;  %s4613_s3 = inlined_call_operand.vmem [shape: f32[2,1,32], index: 3, kind: input, shape index: {}]   ;;  %s4614_s4 = inlined_call_operand.vmem [shape: bf16[2,128,32], index: 4, kind: output, shape index: {0}]   ;;  %s4615_s5 = inlined_call_operand.hbm [shape: f32[2,1,128], index: 5, kind: output, shape index: {1}]   ;;  %s4616_s6 = inlined_call_operand.vmem [shape: f32[2,128,1], index: 6, kind: output, shape index: {2}]  }
   0x1   :  { %14 = vsyncpa [#allocation3 + $0x1], 0  ;;  %s3679_s21 = smov 0   ;;  %s3681_s22 = smov 0  }
   0x2   :  { %s3683_s23 = smov 0   ;;  %s3685_s24 = smov 0  }
   0x3   :  { %s3687_s25 = smov 0   ;;  %s3689_s26 = smov 0  }
   0x4 LB: > { %s2606_s27 = sadd.s32 4294967295, %s3638_s26   ;;  %s2607_s28 = sadd.s32 4294967294, %s3638_s26   ;;  %s3638_s26 = sphi %s3689_s26, %s20_s26   ;;  %s3634_s25 = sphi %s3687_s25, %s4628_s25   ;;  %s3630_s24 = sphi %s3685_s24, %s4627_s24   ;;  %s3626_s23 = sphi %s3683_s23, %s4626_s23   ;;  %s3622_s22 = sphi %s3681_s22, %s4625_s22   ;;  %s3618_s21 = sphi %s3679_s21, %s4624_s21  }
   0x5   : > { %s29_s29 = sadd.s32 1, %s3634_s25  ;;  %s173_s30 = sadd.s32 1, %s3626_s23 }
   0x6   : > { %p30_p0 = scmp.ge.s32.totalorder %s29_s29, 2  ;;  %p183_p1 = scmp.ne.s32.totalorder %s3626_s23, %s3622_s22 }
   0x7   : > { %p184_p2 = scmp.eq.s32.totalorder %s2606_s27, 1  ;;  %p189_p3 = scmp.ne.s32.totalorder %s3622_s22, %s3618_s21 }
   0x8   : > { %s4630_s29 = smov (%p30_p0, %s29_s29), 0  ;;  %p190_p5 = scmp.eq.s32.totalorder %s2607_s28, 1 }
   0x9   : > { %p3719_p4 = por %p184_p2, %p183_p1  ;;  %s168_s8 = ssub.s32 %s3634_s25, %s4630_s29 }
   0xa   : > { %p2611_p6 = scmp.ge.s32.totalorder %s3638_s26, 1  ;;  %p171_p7 = scmp.eq.s32.totalorder %s168_s8, 0 }
   0xb   : > { %p3726_p8 = por %p190_p5, %p189_p3  ;;  %p265_p9 = scmp.lt.s32.totalorder %s3638_s26, 3 }
   0xc   : > { %s3732_s10 = scalar_select %p171_p7, %s3626_s23, %s173_s30  }
   0xd   : > { %p266_p10 = pnand %p2611_p6, %p265_p9 }
   0xe   : > { %p329_p11 = scmp.lt.s32.totalorder (!%p266_p10), %s3630_s24, 1  ;;  %v360_v0 = vld [vmem:[%s4610_s0] sm:$0xff] (!%p266_p10)  ;;  %vm378_vm0 = vcmask (!%p266_p10), 130048   ;;  %v361_v10 = vld [vmem:[%s4610_s0 + $0x8] sm:$0xff] (!%p266_p10)  ;;  %v362_v11 = vld [vmem:[%s4610_s0 + $0x10] sm:$0xff] (!%p266_p10)  ;;  %vm3641_vm1 = vmmov (!%p266_p10), 0  }
   0xf   : > { %269 = sbr.rel (%p266_p10) target bundleno = 879 (0x36f), region = 36  ;;  %v380_v1 = vsel (!%p266_p10), %vm378_vm0, %v360_v0, 0  ;;  %v363_v12 = vld [vmem:[%s4610_s0 + $0x18] sm:$0xff] (!%p266_p10)  ;;  %v383_v15 = vsel (!%p266_p10), %vm378_vm0, %v361_v10, 0  ;;  %v386_v18 = vsel (!%p266_p10), %vm378_vm0, %v362_v11, 0  ;;  %v364_v20 = vld [vmem:[%s4610_s0 + $0x20] sm:$0xff] (!%p266_p10) }
  0x10   : > { %v3742_v2 = vand.u32 (!%p266_p10), 4294901760, %v380_v1  ;;  %v389_v19 = vsel (!%p266_p10), %vm378_vm0, %v363_v12, 0  ;;  %v3780_v23 = vand.u32 (!%p266_p10), 4294901760, %v383_v15  ;;  %v365_v24 = vld [vmem:[%s4610_s0 + $0x28] sm:$0xff] (!%p266_p10)  ;;  %v3785_v25 = vand.u32 (!%p266_p10), 4294901760, %v386_v18  ;;  %v366_v33 = vld [vmem:[%s4610_s0 + $0x30] sm:$0xff] (!%p266_p10) }
  0x11   : > { %v3787_v26 = vand.u32 (!%p266_p10), 4294901760, %v389_v19  ;;  %v392_v31 = vsel (!%p266_p10), %vm378_vm0, %v364_v20, 0  ;;  %v395_v32 = vsel (!%p266_p10), %vm378_vm0, %v365_v24, 0  ;;  %v367_v36 = vld [vmem:[%s4610_s0 + $0x38] sm:$0xff] (!%p266_p10)  ;;  %v398_v43 = vsel (!%p266_p10), %vm378_vm0, %v366_v33, 0  ;;  %v368_v47 = vld [vmem:[%s4610_s0 + $0x40] sm:$0xff] (!%p266_p10) }
  0x12   : > { %2899 = vmatprep.mubr.f32.mxu0 (!%p266_p10), %v3742_v2  ;;  %v3790_v27 = vsub.f32 (!%p266_p10), %v380_v1, %v3742_v2  ;;  %v3793_v29 = vsub.f32 (!%p266_p10), %v383_v15, %v3780_v23  ;;  %v3803_v34 = vsub.f32 (!%p266_p10), %v386_v18, %v3785_v25  ;;  %v3813_v39 = vand.u32 (!%p266_p10), 4294901760, %v392_v31  ;;  %v369_v51 = vld [vmem:[%s4610_s0 + $0x48] sm:$0xff] (!%p266_p10)  ;;  %v370_v62 = vld [vmem:[%s4610_s0 + $0x50] sm:$0xff] (!%p266_p10)  ;;  %v372_v18 = vld [vmem:[%s4610_s0 + $0x60] sm:$0xff] (!%p266_p10)  ;;  %s2635_s30 = sshll.u32 (!%p266_p10), %s3630_s24, 4 }
  0x13   : > { %v3810_v37 = vsub.f32 (!%p266_p10), %v389_v19, %v3787_v26  ;;  %v3819_v42 = vand.u32 (!%p266_p10), 4294901760, %v395_v32  ;;  %v401_v46 = vsel (!%p266_p10), %vm378_vm0, %v367_v36, 0  ;;  %v3847_v55 = vand.u32 (!%p266_p10), 4294901760, %v398_v43 }
  0x14   : > { %v496_v35 = vand.u32 (!%p266_p10), 4294901760, %v3790_v27  ;;  %v506_v38 = vand.u32 (!%p266_p10), 4294901760, %v3793_v29  ;;  %v516_v40 = vand.u32 (!%p266_p10), 4294901760, %v3803_v34  ;;  %v3831_v48 = vsub.f32 (!%p266_p10), %v392_v31, %v3813_v39 }
  0x15   : > { %v526_v44 = vand.u32 (!%p266_p10), 4294901760, %v3810_v37  ;;  %v3841_v52 = vsub.f32 (!%p266_p10), %v395_v32, %v3819_v42  ;;  %v3850_v58 = vand.u32 (!%p266_p10), 4294901760, %v401_v46  ;;  %v404_v59 = vsel (!%p266_p10), %vm378_vm0, %v368_v47, 0 }
  0x16   : > { %s3740_s13 = scalar_select %p329_p11, %s3630_s24, 1  ;;  %v497_v41 = vsub.f32 %v3790_v27, %v496_v35  ;;  %v507_v45 = vsub.f32 %v3793_v29, %v506_v38  ;;  %v517_v50 = vsub.f32 %v3803_v34, %v516_v40  ;;  %v536_v56 = vand.u32 4294901760, %v3831_v48 }
  0x17   : > { %v527_v54 = vsub.f32 %v3810_v37, %v526_v44  ;;  %v546_v60 = vand.u32 4294901760, %v3841_v52  ;;  %v407_v61 = vsel %vm378_vm0, %v369_v51, 0  ;;  %v3860_v63 = vsub.f32 %v398_v43, %v3847_v55  ;;  %s3643_s24 = smov [#allocation2]  }
  0x18   : > { %s2638_s14 = sshll.u32 %s3740_s13, 4  ;;  %v498_v49 = vand.u32 4294901760, %v497_v41  ;;  %v508_v53 = vand.u32 4294901760, %v507_v45  ;;  %v518_v57 = vand.u32 4294901760, %v517_v50  ;;  %v537_v1 = vsub.f32 %v3831_v48, %v536_v56  ;;  %v374_v45 = vld [vmem:[%s4610_s0 + $0x70] sm:$0xff]  ;;  %v375_v50 = vld [vmem:[%s4610_s0 + $0x78] sm:$0xff]  ;;  %s339_s8 = scalar_lea.vmem %s4613_s3, %s3740_s13 }
  0x19   : > { %s333_s17 = scalar_lea.vmem %s4611_s1, %s2638_s14  ;;  %v528_v0 = vand.u32 4294901760, %v527_v54  ;;  %v556_v10 = vand.u32 4294901760, %v3860_v63  ;;  %v3879_v12 = vand.u32 4294901760, %v407_v61  ;;  %v410_v15 = vsel %vm378_vm0, %v370_v62, 0  ;;  %s2639_s11 = sshll.u32 %s3740_s13, 6 }
  0x1a   : > { %v376_v3 = vld [vmem:[%s333_s17] sm:$0xff]  ;;  %v377_v4 = vld [vmem:[%s333_s17 + $0x8] sm:$0xff]  ;;  %2871 = vmatprep.mubr.f32.mxu1 %v498_v49  ;;  %v538_v11 = vand.u32 4294901760, %v537_v1  ;;  %v416_v36 = vsel %vm378_vm0, %v372_v18, 0  ;;  %v422_v62 = vsel %vm378_vm0, %v374_v45, 0  ;;  %v425_v1 = vsel %vm378_vm0, %v375_v50, 0  ;;  %s336_s15 = scalar_lea.vmem %s4612_s2, %s3740_s13  ;;  %s4088_s18 = scalar_lea.vmem %s4614_s4, %s2639_s11 }
  0x1b   : > { %v428_v5 = vand.u32 4294901760, %v376_v3  ;;  %v431_v6 = vand.u32 4294901760, %v377_v4  ;;  %v3898_v24 = vsub.f32 %v407_v61, %v3879_v12  ;;  %v3932_v54 = vand.u32 4294901760, %v416_v36  ;;  %s2640_s19 = sshll.u32 %s3740_s13, 7  ;;  %s310_s13 = sand.u32 1, %s3622_s22  }
  0x1c   : > { %v3954_v18 = vand.u32 4294901760, %v422_v62  ;;  %vm1613_vm2 = vcmask 261120   ;;  %vm1595_vm3 = vcmask 257024   ;;  %s4491_s28 = scalar_lea.vmem %s4616_s6, %s2640_s19  ;;  %vm2378_vm4 = vcmask 7168   ;;  %s2405_s16 = scalar_lea.sflag [#allocation3], %s310_s13 }
  0x1d   : > { %v3749_v7 = vpack.c.bf16 %v431_v6, %v428_v5  ;;  %v3751_v8 = vsub.f32 %v376_v3, %v428_v5  ;;  %v3753_v9 = vsub.f32 %v377_v4, %v431_v6  ;;  %v371_v3 = vld [vmem:[%s4610_s0 + $0x58] sm:$0xff]  ;;  %v3870_v4 = vsub.f32 %v401_v46, %v3850_v58 }
  0x1e   : > { %v547_v5 = vsub.f32 %v3841_v52, %v546_v60  ;;  %v3876_v6 = vand.u32 4294901760, %v404_v59  ;;  %v586_v41 = vand.u32 4294901760, %v3898_v24 }
  0x1f   : > { %v657_v13 = vand.u32 4294901760, %v3751_v8  ;;  %v664_v14 = vand.u32 4294901760, %v3753_v9  ;;  %3246 = vmatprep.subr.bf16.mxu1 %v3749_v7  ;;  %v3253_v30 = vpack.c.bf16 %v3753_v9, %v3751_v8 }
  0x20   : > { %3248 = vmatpush3.bf16.msra.mxu1 %v3749_v7  ;;  %v3888_v19 = vsub.f32 %v404_v59, %v3876_v6  ;;  %v548_v20 = vand.u32 4294901760, %v547_v5 }
  0x21   : > { %v658_v16 = vsub.f32 %v3751_v8, %v657_v13  ;;  %v665_v17 = vsub.f32 %v3753_v9, %v664_v14 }
  0x22   : > { %v576_v31 = vand.u32 4294901760, %v3888_v19 }
  0x23   : > { %v659_v21 = vand.u32 4294901760, %v658_v16  ;;  %v666_v22 = vand.u32 4294901760, %v665_v17  ;;  %2872 = vmatmul.mubr.f32.vlgmr.msra.gmra.mrb[0].mxu1 %v508_v53  ;;  %v566_v16 = vand.u32 4294901760, %v3870_v4  ;;  %v413_v17 = vsel %vm378_vm0, %v371_v3, 0 }
  0x24   : > { %2874 = vmatprep.mubr.f32.mxu1 %v518_v57  ;;  %v3907_v33 = vand.u32 4294901760, %v413_v17  ;;  %v577_v49 = vsub.f32 %v3888_v19, %v576_v31  ;;  %v587_v53 = vsub.f32 %v3898_v24, %v586_v41  ;;  %v3941_v3 = vsub.f32 %v416_v36, %v3932_v54 }
  0x25   : > { %v3249_v28 = vpack.c.bf16 %v666_v22, %v659_v21  ;;  %v557_v21 = vsub.f32 %v3860_v63, %v556_v10  ;;  %v373_v22 = vld [vmem:[%s4610_s0 + $0x68] sm:$0xff] }
  0x26   : > { %v419_v43 = vsel %vm378_vm0, %v373_v22, 0  ;;  %v3926_v51 = vsub.f32 %v413_v17, %v3907_v33  ;;  %v578_v59 = vand.u32 4294901760, %v577_v49  ;;  %v588_v5 = vand.u32 4294901760, %v587_v53 }
  0x27   : > { %3250 = vmatprep.subr.bf16.mxu0 %v3249_v28  ;;  %2875 = vmatmul.mubr.f32.gmra.mrb[2].mxu1 %v528_v0  ;;  %v558_v32 = vand.u32 4294901760, %v557_v21  ;;  %v3935_v61 = vand.u32 4294901760, %v419_v43  ;;  %v3957_v22 = vand.u32 4294901760, %v425_v1 }
  0x28   : > { %3252 = vmatpush3.bf16.msra.mxu0 %v3249_v28  ;;  %2877 = vmatprep.mubr.f32.mxu1 %v538_v11  ;;  %v567_v28 = vsub.f32 %v3870_v4, %v566_v16  ;;  %v606_v0 = vand.u32 4294901760, %v3926_v51 }
  0x29   : > { %3254 = vmatprep.subr.bf16.mxu0 %v3253_v30  ;;  %v645_v45 = vsub.f32 %v425_v1, %v3957_v22 }
  0x2a   : > { %v568_v47 = vand.u32 4294901760, %v567_v28  ;;  %v607_v17 = vsub.f32 %v3926_v51, %v606_v0 }
  0x2b   : > { %2900 = vmatmul.mubr.f32.vlgmr.msra.gmra.mrb[0].mxu0 %v3780_v23  ;;  %2878 = vmatmul.mubr.f32.gmra.mrb[4].mxu1 %v548_v20  ;;  %v616_v20 = vand.u32 4294901760, %v3941_v3  ;;  %v646_v53 = vand.u32 4294901760, %v645_v45 }
  0x2c   : > { %3256 = vmatpush3.bf16.msra.mxu0 %v3253_v30  ;;  %2902 = vmatprep.mubr.f32.mxu0 %v3785_v25  ;;  %v3904_v30 = vand.u32 4294901760, %v410_v15  ;;  %v608_v36 = vand.u32 4294901760, %v607_v17  ;;  %v3261_v17 = vpack.c.bf16 %v664_v14, %v657_v13  ;;  %v3640_v13 = vmov 0.0|0.0  }
  0x2d   : > { %3258 = vmatprep.subr.bf16.mxu0 %v3749_v7  ;;  %2880 = vmatprep.mubr.f32.mxu1 %v558_v32  ;;  %v635_v32 = vsub.f32 %v422_v62, %v3954_v18  ;;  %v647_v62 = vsub.f32 %v645_v45, %v646_v53 }
  0x2e   : > { %v3916_v46 = vsub.f32 %v410_v15, %v3904_v30  ;;  %v3948_v15 = vsub.f32 %v419_v43, %v3935_v61  ;;  %v617_v43 = vsub.f32 %v3941_v3, %v616_v20  ;;  %3317 = vmatprep.subr.bf16.mxu1 %v3640_v13 }
  0x2f   : > { %2903 = vmatmul.mubr.f32.gmra.mrb[2].mxu0 %v3787_v26  ;;  %2881 = vmatmul.mubr.f32.gmra.mrb[6].mxu1 %v568_v47  ;;  %v636_v49 = vand.u32 4294901760, %v635_v32  ;;  %v648_v1 = vand.u32 4294901760, %v647_v62 }
  0x30   : > { %2905 = vmatprep.mubr.f32.mxu0 %v3813_v39  ;;  %v596_v57 = vand.u32 4294901760, %v3916_v46  ;;  %2883 = vmatprep.mubr.f32.mxu1 %v578_v59  ;;  %v626_v28 = vand.u32 4294901760, %v3948_v15  ;;  %v618_v50 = vand.u32 4294901760, %v617_v43 }
  0x32   : > { %v597_v11 = vsub.f32 %v3916_v46, %v596_v57  ;;  %v627_v47 = vsub.f32 %v3948_v15, %v626_v28 }
  0x33   : > { %2906 = vmatmul.mubr.f32.gmra.mrb[4].mxu0 %v3819_v42  ;;  %2884 = vmatmul.mubr.f32.gmra.mrb[8].mxu1 %v588_v5 }
  0x34   : > { %2908 = vmatprep.mubr.f32.mxu0 %v3847_v55  ;;  %v598_v21 = vand.u32 4294901760, %v597_v11  ;;  %v628_v59 = vand.u32 4294901760, %v627_v47  ;;  %v637_v11 = vsub.f32 %v635_v32, %v636_v49 }
  0x36   : > { %2886 = vmatprep.mubr.f32.mxu1 %v598_v21  ;;  %v638_v5 = vand.u32 4294901760, %v637_v11 }
  0x37   : > { %2909 = vmatmul.mubr.f32.gmra.mrb[6].mxu0 %v3850_v58  ;;  %2887 = vmatmul.mubr.f32.gmra.mrb[10].mxu1 %v608_v36 }
  0x38   : > { %2911 = vmatprep.mubr.f32.mxu0 %v3876_v6  ;;  %2889 = vmatprep.mubr.f32.mxu1 %v618_v50 }
  0x3b   : > { %2912 = vmatmul.mubr.f32.gmra.mrb[8].mxu0 %v3879_v12  ;;  %2890 = vmatmul.mubr.f32.gmra.mrb[12].mxu1 %v628_v59 }
  0x3c   : > { %2914 = vmatprep.mubr.f32.mxu0 %v3904_v30  ;;  %2892 = vmatprep.mubr.f32.mxu1 %v638_v5 }
  0x3f   : > { %2915 = vmatmul.mubr.f32.gmra.mrb[10].mxu0 %v3907_v33  ;;  %2893 = vmatmul.mubr.f32.gmra.mrb[14].mxu1 %v648_v1 }
  0x40   : > { %2917 = vmatprep.mubr.f32.mxu0 %v3932_v54 }
  0x43   : > { %2918 = vmatmul.mubr.f32.gmra.mrb[12].mxu0 %v3935_v61 }
  0x44   : > { %2920 = vmatprep.mubr.f32.mxu0 %v3954_v18 }
  0x47   : > { %2921 = vmatmul.mubr.f32.gmra.mrb[14].mxu0 %v3957_v22 }
  0x48   : > { %2927 = vmatprep.mubr.f32.mxu0 %v3790_v27 }
  0x4b   : > { %2928 = vmatmul.mubr.f32.vlgmr.msra.gmra.mrb[0].mxu0 %v3793_v29 }
  0x4c   : > { %3260 = vmatpush3.bf16.msra.mxu0 %v3749_v7  ;;  %2930 = vmatprep.mubr.f32.mxu0 %v3803_v34 }
  0x4d   : > { %3262 = vmatprep.subr.bf16.mxu0 %v3261_v17 }
  0x4f   : > { %2931 = vmatmul.mubr.f32.gmra.mrb[2].mxu0 %v3810_v37 }
  0x50   : > { %2933 = vmatprep.mubr.f32.mxu0 %v3831_v48 }
  0x53   : > { %2934 = vmatmul.mubr.f32.gmra.mrb[4].mxu0 %v3841_v52 }
  0x54   : > { %2936 = vmatprep.mubr.f32.mxu0 %v3860_v63 }
  0x57   : > { %2937 = vmatmul.mubr.f32.gmra.mrb[6].mxu0 %v3870_v4  ;;  %v1612_v4 = vld [vmem:[%s336_s15] sm:$0x1]  ;;  %s4563_s15 = scalar_lea.hbm %s4615_s5, %s2635_s30 }
  0x58   : > { %2939 = vmatprep.mubr.f32.mxu0 %v3888_v19 }
  0x5b   : > { %2940 = vmatmul.mubr.f32.gmra.mrb[8].mxu0 %v3898_v24 }
  0x5c   : > { %2942 = vmatprep.mubr.f32.mxu0 %v3916_v46 }
  0x5f   : > { %2943 = vmatmul.mubr.f32.gmra.mrb[10].mxu0 %v3926_v51  ;;  %v4102_v51 = vsel %vm1613_vm2, %v1612_v4, 0 }
  0x60   : > { %2945 = vmatprep.mubr.f32.mxu0 %v3941_v3 }
  0x63   : > { %2946 = vmatmul.mubr.f32.gmra.mrb[12].mxu0 %v3948_v15 }
  0x64   : > { %2948 = vmatprep.mubr.f32.mxu0 %v635_v32 }
  0x67   : > { %2949 = vmatmul.mubr.f32.gmra.mrb[14].mxu0 %v645_v45 }
  0x68   : > { %2955 = vmatprep.mubr.f32.mxu0 %v496_v35 }
  0x6b   : > { %2956 = vmatmul.mubr.f32.vlgmr.msra.gmra.mrb[0].mxu0 %v506_v38 }
  0x6c   : > { %3264 = vmatpush3.bf16.msra.mxu0 %v3261_v17  ;;  %2958 = vmatprep.mubr.f32.mxu0 %v516_v40 }
  0x6d   : > { %3266 = vmatprep.subr.bf16.mxu0 %v3749_v7 }
  0x6f   : > { %2959 = vmatmul.mubr.f32.gmra.mrb[2].mxu0 %v526_v44  ;;  %v4079_v44 = vld [vmem:[%s339_s8] ss:$0 sm:$0xff]  ;;  %s311_s8 = scalar_lea.vmem [#allocation2], %s310_s13 }
  0x70   : > { %2961 = vmatprep.mubr.f32.mxu0 %v536_v56  ;;  %s2431_s11 = sshll.u32 %s311_s8, 4  ;;  %s4565_s11 = int_to_ptr.vmem [resolvable:$true] %s2431_s11 }
  0x71   : > { %s3560_s17 = scalar_lea.vmem %s4565_s11, 16 }
  0x72   : > { %p3561_p12 = scmp.ne.s32.totalorder %s4565_s11, %s3560_s17 }
  0x73   : > { %2962 = vmatmul.mubr.f32.gmra.mrb[4].mxu0 %v546_v60 }
  0x74   : > { %2964 = vmatprep.mubr.f32.mxu0 %v556_v10  ;;  %p3562_p13 = pnand %p3561_p12, %p3719_p4 }
  0x76   : > { %p3563_p0 = pneg %p3562_p13 }
  0x77   : > { %2965 = vmatmul.mubr.f32.gmra.mrb[6].mxu0 %v566_v16 }
  0x78   : > { %2967 = vmatprep.mubr.f32.mxu0 %v576_v31 }
  0x7b   : > { %2968 = vmatmul.mubr.f32.gmra.mrb[8].mxu0 %v586_v41 }
  0x7c   : > { %2970 = vmatprep.mubr.f32.mxu0 %v596_v57 }
  0x7f   : > { %2971 = vmatmul.mubr.f32.gmra.mrb[10].mxu0 %v606_v0 }
  0x80   : > { %2973 = vmatprep.mubr.f32.mxu0 %v616_v20 }
  0x83   : > { %2974 = vmatmul.mubr.f32.gmra.mrb[12].mxu0 %v626_v28 }
  0x84   : > { %2976 = vmatprep.mubr.f32.mxu0 %v636_v49 }
  0x87   : > { %2977 = vmatmul.mubr.f32.gmra.mrb[14].mxu0 %v646_v53 }
  0x88   : > { %2983 = vmatprep.mubr.f32.mxu0 %v3742_v2 }
  0x8b   : > { %2984 = vmatmul.mubr.f32.vlgmr.msra.gmra.mrb[0].mxu0 %v3780_v23 }
  0x8c   : > { %3268 = vmatpush3.bf16.msra.mxu0 %v3749_v7  ;;  %2986 = vmatprep.mubr.f32.mxu0 %v3785_v25 }
  0x8d   : > { %3269 = vmatprep.subr.bf16.mxu0 %v3640_v13 }
  0x8f   : > { %2987 = vmatmul.mubr.f32.gmra.mrb[2].mxu0 %v3787_v26 }
  0x90   : > { %2989 = vmatprep.mubr.f32.mxu0 %v3813_v39 }
  0x93   : > { %2990 = vmatmul.mubr.f32.gmra.mrb[4].mxu0 %v3819_v42 }
  0x94   : > { %2992 = vmatprep.mubr.f32.mxu0 %v3847_v55 }
  0x97   : > { %2993 = vmatmul.mubr.f32.gmra.mrb[6].mxu0 %v3850_v58 }
  0x98   : > { %2995 = vmatprep.mubr.f32.mxu0 %v3876_v6 }
  0x9b   : > { %2996 = vmatmul.mubr.f32.gmra.mrb[8].mxu0 %v3879_v12 }
  0x9c   : > { %2998 = vmatprep.mubr.f32.mxu0 %v3904_v30 }
  0x9f   : > { %2999 = vmatmul.mubr.f32.gmra.mrb[10].mxu0 %v3907_v33 }
  0xa0   : > { %3001 = vmatprep.mubr.f32.mxu0 %v3932_v54 }
  0xa3   : > { %3002 = vmatmul.mubr.f32.gmra.mrb[12].mxu0 %v3935_v61 }
  0xa4   : > { %3004 = vmatprep.mubr.f32.mxu0 %v3954_v18 }
  0xa7   : > { %3005 = vmatmul.mubr.f32.gmra.mrb[14].mxu0 %v3957_v22 }
  0xa8   : > { %3011 = vmatprep.mubr.f32.mxu0 %v3742_v2 }
  0xab   : > { %3012 = vmatmul.mubr.f32.vlgmr.msra.gmra.mrb[0].mxu0 %v3780_v23 }
  0xac   : > { %3014 = vmatprep.mubr.f32.mxu0 %v3785_v25 }
  0xaf   : > { %3015 = vmatmul.mubr.f32.gmra.mrb[2].mxu0 %v3787_v26 }
  0xb0   : > { %3017 = vmatprep.mubr.f32.mxu0 %v3813_v39 }
  0xb3   : > { %3018 = vmatmul.mubr.f32.gmra.mrb[4].mxu0 %v3819_v42  ;;  %v4617_v42 = vmov 0.0  }
  0xb4   : > { %3020 = vmatprep.mubr.f32.mxu0 %v3847_v55  ;;  %3137 = vmatprep.mubr.msk.f32.mxu1 %vm3641_vm1, %v4617_v42 }
  0xb7   : > { %3021 = vmatmul.mubr.f32.gmra.mrb[6].mxu0 %v3850_v58 }
  0xb8   : > { %3023 = vmatprep.mubr.f32.mxu0 %v3876_v6 }
  0xbb   : > { %3024 = vmatmul.mubr.f32.gmra.mrb[8].mxu0 %v3879_v12 }
  0xbc   : > { %3026 = vmatprep.mubr.f32.mxu0 %v3904_v30 }
  0xbf   : > { %3027 = vmatmul.mubr.f32.gmra.mrb[10].mxu0 %v3907_v33 }
  0xc0   : > { %3029 = vmatprep.mubr.f32.mxu0 %v3932_v54 }
  0xc3   : > { %3030 = vmatmul.mubr.f32.gmra.mrb[12].mxu0 %v3935_v61 }
  0xc4   : > { %3032 = vmatprep.mubr.f32.mxu0 %v3954_v18 }
  0xc7   : > { %3033 = vmatmul.mubr.f32.gmra.mrb[14].mxu0 %v3957_v22 }
  0xc8   : > { %3067 = vmatprep.mubr.msk.f32.mxu0 %vm3641_vm1, %v4617_v42 }
  0xf6   : > { %v2873_v2 = vpop.f32.mrb[0].mxu1 }
  0xf7   : > { %v500_v7 = vpop.f32.mrb[1].mxu1 }
  0xfa   : > { %v2876_v8 = vpop.f32.mrb[2].mxu1 }
  0xfb   : > { %v520_v9 = vpop.f32.mrb[3].mxu1 }
  0xfe   : > { %v2879_v14 = vpop.f32.mrb[4].mxu1 }
  0xff   : > { %v4048_v23 = vpop.f32.mrb[5].mxu1 }
 0x102   : > { %v4050_v25 = vpop.f32.mrb[6].mxu1 }
 0x103   : > { %v4052_v26 = vpop.f32.mrb[7].mxu1 }
 0x106   : > { %v4054_v27 = vpop.f32.mrb[8].mxu1 }
 0x107   : > { %v4056_v29 = vpop.f32.mrb[9].mxu1 }
 0x10a   : > { %v4058_v34 = vpop.f32.mrb[10].mxu1 }
 0x10b   : > { %v4060_v35 = vpop.f32.mrb[11].mxu1 }
 0x10e   : > { %v4062_v37 = vpop.f32.mrb[12].mxu1 }
 0x10f   : > { %v4064_v38 = vpop.f32.mrb[13].mxu1 }
 0x112   : > { %v4066_v39 = vpop.f32.mrb[14].mxu1 }
 0x113   : > { %v4068_v40 = vpop.f32.mrb[15].mxu1 }
 0x17e   : > { %v3013_v48 = vpop.f32.mrb[0].mxu0 }
 0x17f   : > { %v3413_v52 = vadd.f32 %v3013_v48, %v2873_v2  ;;  %v1437_v55 = vpop.f32.mrb[1].mxu0 }
 0x180   : > { %v3414_v56 = vadd.f32 %v1437_v55, %v500_v7 }
 0x181   : > { %v2642_v58 = vpack.c.bf16 %v3413_v52, %v3413_v52  ;;  %v1621_v60 = vsel %vm1613_vm2, %v3413_v52, 0  ;;  %v2315_v63 = vmul.f32 %v3413_v52, %v4079_v44 }
 0x182   : > { %v1669_v6 = vand.u32 4294901760, %v1621_v60  ;;  %v2641_v10 = vpack.c.bf16 %v3414_v56, %v3414_v56  ;;  %v1618_v12 = vsel %vm1613_vm2, %v3414_v56, 0  ;;  %v3016_v16 = vpop.f32.mrb[2].mxu0  ;;  %v2314_v19 = vmul.f32 %v3414_v56, %v4079_v44 }
 0x183   : > { %1597 = vst.msk [vmem:[%s4088_s18 + $0x4] sm:$0xf] %vm1595_vm3, %v2642_v58  ;;  %v1666_v24 = vand.u32 4294901760, %v1618_v12  ;;  %v3415_v30 = vadd.f32 %v3016_v16, %v2876_v8  ;;  %v1449_v31 = vpop.f32.mrb[3].mxu0  ;;  %v2333_v33 = vsel %vm1613_vm2, %v2315_v63, 0.0 }
 0x184   : > { %v4097_v41 = vsub.f32 %v1621_v60, %v1669_v6  ;;  %1596 = vst.msk [vmem:[%s4088_s18] sm:$0xf] %vm1595_vm3, %v2641_v10  ;;  %v3416_v46 = vadd.f32 %v1449_v31, %v520_v9  ;;  %2334 = vadd.xlane.f32.xlu0 %v2333_v33  ;;  %v2330_v21 = vsel %vm1613_vm2, %v2314_v19, 0.0 }
 0x185   : > { %v4104_v54 = vsub.f32 %v1618_v12, %v1666_v24  ;;  %v2644_v57 = vpack.c.bf16 %v3415_v30, %v3415_v30  ;;  %v1627_v61 = vsel %vm1613_vm2, %v3415_v30, 0  ;;  %v4107_v0 = vpack.c.bf16 %v1669_v6, %v1666_v24 }
 0x186   : > { %v1675_v3 = vand.u32 4294901760, %v1627_v61  ;;  %v2643_v15 = vpack.c.bf16 %v3416_v46, %v3416_v46  ;;  %v1624_v18 = vsel %vm1613_vm2, %v3416_v46, 0  ;;  %v3019_v20 = vpop.f32.mrb[4].mxu0  ;;  %v1766_v22 = vand.u32 4294901760, %v4097_v41 }
 0x187   : > { %1599 = vst.msk [vmem:[%s4088_s18 + $0xc] sm:$0xf] %vm1595_vm3, %v2644_v57  ;;  %v1672_v28 = vand.u32 4294901760, %v1624_v18  ;;  %v3417_v32 = vadd.f32 %v3019_v20, %v2879_v14  ;;  %v1461_v36 = vpop.f32.mrb[5].mxu0  ;;  %3271 = vmatpush3.bf16.xpose.msra.mxu0 %v4107_v0  ;;  %v2317_v43 = vmul.f32 %v3415_v30, %v4079_v44  ;;  %v3318_v49 = vpack.c.bf16 %v4097_v41, %v4104_v54 }
 0x188   : > { %v4116_v45 = vsub.f32 %v1627_v61, %v1675_v3  ;;  %1598 = vst.msk [vmem:[%s4088_s18 + $0x8] sm:$0xf] %vm1595_vm3, %v2643_v15  ;;  %v3418_v47 = vadd.f32 %v1461_v36, %v4048_v23  ;;  %2331 = vadd.xlane.f32.xlu0 %v2330_v21  ;;  %v2316_v50 = vmul.f32 %v3416_v46, %v4079_v44  ;;  %v1759_v53 = vand.u32 4294901760, %v4104_v54 }
 0x189   : > { %v2646_v59 = vpack.c.bf16 %v3417_v32, %v3417_v32  ;;  %v4126_v11 = vsel %vm1613_vm2, %v3417_v32, 0  ;;  %v2339_v62 = vsel %vm1613_vm2, %v2317_v43, 0.0  ;;  %3272 = vmatprep.subr.bf16.mxu0 %v3640_v13  ;;  %v4130_v5 = vsub.f32 %v1624_v18, %v1672_v28  ;;  %3319 = vmatpush3.bf16.xpose.msra.mxu1 %v3318_v49 }
 0x18a   : > { %v1681_v1 = vand.u32 4294901760, %v4126_v11  ;;  %v2645_v17 = vpack.c.bf16 %v3418_v47, %v3418_v47  ;;  %v4134_v2 = vsel %vm1613_vm2, %v3418_v47, 0  ;;  %2340 = vadd.xlane.f32.xlu1 %v2339_v62  ;;  %v3022_v7 = vpop.f32.mrb[6].mxu0  ;;  %v1780_v8 = vand.u32 4294901760, %v4116_v45  ;;  %3320 = vmatprep.subr.bf16.mxu1 %v3640_v13 }
 0x18b   : > { %1601 = vst.msk [vmem:[%s4088_s18 + $0x14] sm:$0xf] %vm1595_vm3, %v2646_v59  ;;  %v1678_v9 = vand.u32 4294901760, %v4134_v2  ;;  %v3419_v14 = vadd.f32 %v3022_v7, %v4050_v25  ;;  %v1473_v23 = vpop.f32.mrb[7].mxu0  ;;  %v2336_v48 = vsel %vm1613_vm2, %v2316_v50, 0.0  ;;  %v2318_v56 = vmul.f32 %v3418_v47, %v4079_v44 }
 0x18c   : > { %v4146_v52 = vsub.f32 %v4126_v11, %v1681_v1  ;;  %1600 = vst.msk [vmem:[%s4088_s18 + $0x10] sm:$0xf] %vm1595_vm3, %v2645_v17  ;;  %v3420_v55 = vadd.f32 %v1473_v23, %v4052_v26  ;;  %v4152_v58 = vpack.c.bf16 %v1675_v3, %v1672_v28  ;;  %v2319_v4 = vmul.f32 %v3417_v32, %v4079_v44 }
 0x18d   : > { %v4155_v25 = vsub.f32 %v4134_v2, %v1678_v9  ;;  %v2648_v60 = vpack.c.bf16 %v3419_v14, %v3419_v14  ;;  %v4158_v63 = vsel %vm1613_vm2, %v3419_v14, 0  ;;  %v1773_v6 = vand.u32 4294901760, %v4130_v5 }
 0x18e   : > { %v1687_v10 = vand.u32 4294901760, %v4158_v63  ;;  %v2647_v12 = vpack.c.bf16 %v3420_v55, %v3420_v55  ;;  %v4164_v26 = vsel %vm1613_vm2, %v3420_v55, 0  ;;  %2337 = vadd.xlane.f32.xlu1 %v2336_v48  ;;  %v3025_v16 = vpop.f32.mrb[8].mxu0  ;;  %v1794_v19 = vand.u32 4294901760, %v4146_v52 }
 0x18f   : > { %1603 = vst.msk [vmem:[%s4088_s18 + $0x1c] sm:$0xf] %vm1595_vm3, %v2648_v60  ;;  %v1684_v24 = vand.u32 4294901760, %v4164_v26  ;;  %v2342_v30 = vsel %vm1613_vm2, %v2318_v56, 0.0  ;;  %v3421_v31 = vadd.f32 %v3025_v16, %v4054_v27  ;;  %v1485_v33 = vpop.f32.mrb[9].mxu0  ;;  %3274 = vmatpush3.bf16.xpose.msra.mxu0 %v4152_v58  ;;  %v1787_v46 = vand.u32 4294901760, %v4155_v25 }
 0x190   : > { %v4177_v57 = vsub.f32 %v4158_v63, %v1687_v10  ;;  %1602 = vst.msk [vmem:[%s4088_s18 + $0x18] sm:$0xf] %vm1595_vm3, %v2647_v12  ;;  %2343 = vadd.xlane.f32.xlu0 %v2342_v30  ;;  %v3422_v61 = vadd.f32 %v1485_v33, %v4056_v29  ;;  %v3321_v3 = vpack.c.bf16 %v4116_v45, %v4130_v5  ;;  %v2345_v18 = vsel %vm1613_vm2, %v2319_v4, 0.0 }
 0x191   : > { %3275 = vmatprep.subr.bf16.mxu0 %v3640_v13  ;;  %v2650_v27 = vpack.c.bf16 %v3421_v31, %v3421_v31  ;;  %v4186_v15 = vsel %vm1613_vm2, %v3421_v31, 0  ;;  %v2320_v20 = vmul.f32 %v3420_v55, %v4079_v44  ;;  %v4193_v21 = vsub.f32 %v4164_v26, %v1684_v24 }
 0x192   : > { %v1693_v29 = vand.u32 4294901760, %v4186_v15  ;;  %v2649_v28 = vpack.c.bf16 %v3422_v61, %v3422_v61  ;;  %v4197_v32 = vsel %vm1613_vm2, %v3422_v61, 0  ;;  %2346 = vadd.xlane.f32.xlu1 %v2345_v18  ;;  %3322 = vmatpush3.bf16.xpose.msra.mxu1 %v3321_v3  ;;  %v3028_v36 = vpop.f32.mrb[10].mxu0  ;;  %v1808_v43 = vand.u32 4294901760, %v4177_v57 }
 0x193   : > { %1605 = vst.msk [vmem:[%s4088_s18 + $0x24] sm:$0xf] %vm1595_vm3, %v2650_v27  ;;  %v1690_v47 = vand.u32 4294901760, %v4197_v32  ;;  %v2348_v49 = vsel %vm1613_vm2, %v2320_v20, 0.0  ;;  %v3423_v50 = vadd.f32 %v3028_v36, %v4058_v34  ;;  %v1497_v59 = vpop.f32.mrb[11].mxu0  ;;  %3323 = vmatprep.subr.bf16.mxu1 %v3640_v13  ;;  %v2321_v2 = vmul.f32 %v3419_v14, %v4079_v44 }
 0x194   : > { %v4209_v62 = vsub.f32 %v4186_v15, %v1693_v29  ;;  %1604 = vst.msk [vmem:[%s4088_s18 + $0x20] sm:$0xf] %vm1595_vm3, %v2649_v28  ;;  %2349 = vadd.xlane.f32.xlu0 %v2348_v49  ;;  %v3424_v17 = vadd.f32 %v1497_v59, %v4060_v35  ;;  %v2322_v7 = vmul.f32 %v3422_v61, %v4079_v44  ;;  %v1801_v35 = vand.u32 4294901760, %v4193_v21 }
 0x195   : > { %v4219_v34 = vsub.f32 %v4197_v32, %v1690_v47  ;;  %v2652_v23 = vpack.c.bf16 %v3423_v50, %v3423_v50  ;;  %v4222_v48 = vsel %vm1613_vm2, %v3423_v50, 0  ;;  %v4226_v55 = vpack.c.bf16 %v1681_v1, %v1678_v9 }
 0x196   : > { %v1699_v14 = vand.u32 4294901760, %v4222_v48  ;;  %v2651_v56 = vpack.c.bf16 %v3424_v17, %v3424_v17  ;;  %v4231_v60 = vsel %vm1613_vm2, %v3424_v17, 0  ;;  %v3031_v4 = vpop.f32.mrb[12].mxu0  ;;  %v1822_v12 = vand.u32 4294901760, %v4209_v62 }
 0x197   : > { %1607 = vst.msk [vmem:[%s4088_s18 + $0x2c] sm:$0xf] %vm1595_vm3, %v2652_v23  ;;  %v1696_v16 = vand.u32 4294901760, %v4231_v60  ;;  %v2351_v11 = vsel %vm1613_vm2, %v2321_v2, 0.0  ;;  %v2354_v1 = vsel %vm1613_vm2, %v2322_v7, 0.0  ;;  %v1509_v9 = vpop.f32.mrb[13].mxu0  ;;  %3277 = vmatpush3.bf16.xpose.msra.mxu0 %v4226_v55  ;;  %v3425_v61 = vadd.f32 %v3031_v4, %v4062_v37 }
 0x198   : > { %v1815_v30 = vand.u32 4294901760, %v4219_v34  ;;  %v4244_v33 = vsub.f32 %v4222_v48, %v1699_v14  ;;  %1606 = vst.msk [vmem:[%s4088_s18 + $0x28] sm:$0xf] %vm1595_vm3, %v2651_v56  ;;  %2352 = vadd.xlane.f32.xlu1 %v2351_v11  ;;  %2355 = vadd.xlane.f32.xlu0 %v2354_v1  ;;  %v3426_v3 = vadd.f32 %v1509_v9, %v4064_v38 }
 0x199   : > { %v4253_v27 = vsub.f32 %v4231_v60, %v1696_v16  ;;  %v2323_v18 = vmul.f32 %v3421_v31, %v4079_v44  ;;  %v3324_v20 = vpack.c.bf16 %v4146_v52, %v4155_v25  ;;  %v2324_v28 = vmul.f32 %v3424_v17, %v4079_v44  ;;  %3278 = vmatprep.subr.bf16.mxu0 %v3640_v13 }
 0x19a   : > { %v1836_v37 = vand.u32 4294901760, %v4244_v33  ;;  %v2654_v36 = vpack.c.bf16 %v3425_v61, %v3425_v61  ;;  %v1657_v38 = vsel %vm1613_vm2, %v3425_v61, 0  ;;  %v2653_v49 = vpack.c.bf16 %v3426_v3, %v3426_v3  ;;  %v3034_v59 = vpop.f32.mrb[14].mxu0 }
 0x19b   : > { %v1829_v2 = vand.u32 4294901760, %v4253_v27  ;;  %v1705_v7 = vand.u32 4294901760, %v1657_v38  ;;  %v1654_v31 = vsel %vm1613_vm2, %v3426_v3, 0  ;;  %v2357_v23 = vsel %vm1613_vm2, %v2323_v18, 0.0  ;;  %3325 = vmatpush3.bf16.xpose.msra.mxu1 %v3324_v20  ;;  %v1521_v56 = vpop.f32.mrb[15].mxu0 }
 0x19c   : > { %1609 = vst.msk [vmem:[%s4088_s18 + $0x34] sm:$0xf] %vm1595_vm3, %v2654_v36  ;;  %1608 = vst.msk [vmem:[%s4088_s18 + $0x30] sm:$0xf] %vm1595_vm3, %v2653_v49  ;;  %v1702_v17 = vand.u32 4294901760, %v1654_v31  ;;  %2358 = vadd.xlane.f32.xlu1 %v2357_v23  ;;  %v2360_v4 = vsel %vm1613_vm2, %v2324_v28, 0.0  ;;  %v3427_v11 = vadd.f32 %v3034_v59, %v4066_v39  ;;  %v3428_v1 = vadd.f32 %v1521_v56, %v4068_v40 }
 0x19d   : > { %3326 = vmatprep.subr.bf16.mxu1 %v3640_v13  ;;  %v4273_v9 = vsub.f32 %v1657_v38, %v1705_v7  ;;  %2361 = vadd.xlane.f32.xlu0 %v2360_v4  ;;  %v2325_v18 = vmul.f32 %v3423_v50, %v4079_v44  ;;  %v2326_v20 = vmul.f32 %v3426_v3, %v4079_v44 }
 0x19e   : > { %v4281_v28 = vpack.c.bf16 %v1687_v10, %v1684_v24  ;;  %v4283_v39 = vsub.f32 %v1654_v31, %v1702_v17  ;;  %v2656_v40 = vpack.c.bf16 %v3427_v11, %v3427_v11  ;;  %v1663_v36 = vsel %vm1613_vm2, %v3427_v11, 0 }
 0x19f   : > { %v2655_v49 = vpack.c.bf16 %v3428_v1, %v3428_v1  ;;  %v1850_v38 = vand.u32 4294901760, %v4273_v9  ;;  %v1711_v59 = vand.u32 4294901760, %v1663_v36  ;;  %v1660_v23 = vsel %vm1613_vm2, %v3428_v1, 0 }
 0x1a0   : > { %v2363_v50 = vsel %vm1613_vm2, %v2325_v18, 0.0  ;;  %3280 = vmatpush3.bf16.xpose.msra.mxu0 %v4281_v28  ;;  %v1843_v26 = vand.u32 4294901760, %v4283_v39  ;;  %1611 = vst.msk [vmem:[%s4088_s18 + $0x3c] sm:$0xf] %vm1595_vm3, %v2656_v40  ;;  %v1708_v63 = vand.u32 4294901760, %v1660_v23  ;;  %v2366_v10 = vsel %vm1613_vm2, %v2326_v20, 0.0 }
 0x1a1   : > { %1610 = vst.msk [vmem:[%s4088_s18 + $0x38] sm:$0xf] %vm1595_vm3, %v2655_v49  ;;  %2364 = vadd.xlane.f32.xlu1 %v2363_v50  ;;  %v2327_v24 = vmul.f32 %v3425_v61, %v4079_v44  ;;  %3281 = vmatprep.subr.bf16.mxu0 %v3640_v13  ;;  %v4298_v3 = vsub.f32 %v1663_v36, %v1711_v59  ;;  %s3564_s18 = sshll.u32 %s3643_s24, 4  ;;  %s3565_s18 = int_to_ptr.vmem [resolvable:$false] %s3564_s18 }
 0x1a2   : > { %2367 = vadd.xlane.f32.xlu0 %v2366_v10  ;;  %v3327_v31 = vpack.c.bf16 %v4177_v57, %v4193_v21  ;;  %v2328_v56 = vmul.f32 %v3428_v1, %v4079_v44  ;;  %v2329_v4 = vmul.f32 %v3427_v11, %v4079_v44  ;;  %v4304_v18 = vsub.f32 %v1660_v23, %v1708_v63  ;;  %s3566_s19 = scalar_lea.vmem %s3565_s18, 32  ;;  %p3567_p1 = scmp.lt.s32.totalorder %s4565_s11, %s3565_s18 }
 0x1a3   : > { %v2369_v40 = vsel %vm1613_vm2, %v2327_v24, 0.0  ;;  %v4311_v61 = vpack.c.bf16 %v1693_v29, %v1690_v47  ;;  %v3330_v20 = vpack.c.bf16 %v4209_v62, %v4219_v34  ;;  %v1864_v36 = vand.u32 4294901760, %v4298_v3  ;;  %p3568_p2 = scmp.lt.s32.totalorder %s3566_s19, %s3560_s17 }
 0x1a4   : > { %3328 = vmatpush3.bf16.xpose.msra.mxu1 %v3327_v31  ;;  %v2372_v1 = vsel %vm1613_vm2, %v2328_v56, 0.0  ;;  %v2375_v44 = vsel %vm1613_vm2, %v2329_v4, 0.0  ;;  %v4322_v11 = vpack.c.bf16 %v1699_v14, %v1696_v16  ;;  %v1857_v15 = vand.u32 4294901760, %v4304_v18 }
 0x1a5   : > { %2370 = vadd.xlane.f32.xlu1 %v2369_v40  ;;  %3329 = vmatprep.subr.bf16.mxu1 %v3640_v13  ;;  %v3333_v29 = vpack.c.bf16 %v4244_v33, %v4253_v27  ;;  %v4328_v32 = vpack.c.bf16 %v1705_v7, %v1702_v17  ;;  %v4332_v49 = vpack.c.bf16 %v1711_v59, %v1708_v63  ;;  %p3569_p3 = por %p3568_p2, %p3567_p1 }
 0x1a6   : > { %2373 = vadd.xlane.f32.xlu0 %v2372_v1  ;;  %v1760_v14 = vsub.f32 %v4104_v54, %v1759_v53  ;;  %v1767_v60 = vsub.f32 %v4097_v41, %v1766_v22  ;;  %v1774_v16 = vsub.f32 %v4130_v5, %v1773_v6  ;;  %v1781_v7 = vsub.f32 %v4116_v45, %v1780_v8 }
 0x1a7   : > { %v1788_v17 = vsub.f32 %v4155_v25, %v1787_v46  ;;  %v1795_v59 = vsub.f32 %v4146_v52, %v1794_v19  ;;  %v1802_v63 = vsub.f32 %v4193_v21, %v1801_v35  ;;  %v1809_v10 = vsub.f32 %v4177_v57, %v1808_v43  ;;  %p3570_p5 = pnand %p3569_p3, %p3563_p0 }
 0x1a8   : > { %3283 = vmatpush3.bf16.xpose.msra.mxu0 %v4311_v61  ;;  %v1761_v23 = vand.u32 4294901760, %v1760_v14  ;;  %v1768_v50 = vand.u32 4294901760, %v1767_v60  ;;  %v1775_v24 = vand.u32 4294901760, %v1774_v16  ;;  %v1782_v31 = vand.u32 4294901760, %v1781_v7 }
 0x1a9   : > { %2376 = vadd.xlane.f32.xlu1 %v2375_v44  ;;  %3284 = vmatprep.subr.bf16.mxu0 %v3640_v13  ;;  %v1789_v56 = vand.u32 4294901760, %v1788_v17  ;;  %v1796_v4 = vand.u32 4294901760, %v1795_v59  ;;  %v1803_v1 = vand.u32 4294901760, %v1802_v63  ;;  %v1810_v42 = vand.u32 4294901760, %v1809_v10 }
 0x1aa   : > { %v3294_v40 = vpack.c.bf16 %v1768_v50, %v1761_v23  ;;  %v1816_v14 = vsub.f32 %v4219_v34, %v1815_v30  ;;  %v3297_v60 = vpack.c.bf16 %v1782_v31, %v1775_v24  ;;  %v1823_v47 = vsub.f32 %v4209_v62, %v1822_v12 }
 0x1ab   : > { %v3300_v48 = vpack.c.bf16 %v1796_v4, %v1789_v56  ;;  %v1830_v44 = vsub.f32 %v4253_v27, %v1829_v2  ;;  %v3303_v16 = vpack.c.bf16 %v1810_v42, %v1803_v1  ;;  %v1837_v17 = vsub.f32 %v4244_v33, %v1836_v37 }
 0x1ac   : > { %3331 = vmatpush3.bf16.xpose.msra.mxu1 %v3330_v20  ;;  %v1817_v7 = vand.u32 4294901760, %v1816_v14  ;;  %v1844_v59 = vsub.f32 %v4283_v39, %v1843_v26  ;;  %v1824_v23 = vand.u32 4294901760, %v1823_v47  ;;  %v1851_v63 = vsub.f32 %v4273_v9, %v1850_v38 }
 0x1ad   : > { %3332 = vmatprep.subr.bf16.mxu1 %v3640_v13  ;;  %v1831_v50 = vand.u32 4294901760, %v1830_v44  ;;  %v1858_v42 = vsub.f32 %v4304_v18, %v1857_v15  ;;  %v1838_v20 = vand.u32 4294901760, %v1837_v17  ;;  %v1865_v24 = vsub.f32 %v4298_v3, %v1864_v36 }
 0x1ae   : > { %v1845_v10 = vand.u32 4294901760, %v1844_v59  ;;  %v4391_v47 = vpack.c.bf16 %v1766_v22, %v1759_v53  ;;  %v3306_v31 = vpack.c.bf16 %v1824_v23, %v1817_v7  ;;  %v1852_v56 = vand.u32 4294901760, %v1851_v63 }
 0x1af   : > { %v1859_v4 = vand.u32 4294901760, %v1858_v42  ;;  %v4397_v1 = vpack.c.bf16 %v1780_v8, %v1773_v6  ;;  %v3309_v14 = vpack.c.bf16 %v1838_v20, %v1831_v50  ;;  %v1866_v44 = vand.u32 4294901760, %v1865_v24 }
 0x1b0   : > { %3286 = vmatpush3.bf16.xpose.msra.mxu0 %v4322_v11  ;;  %v4404_v41 = vpack.c.bf16 %v1794_v19, %v1787_v46  ;;  %v4410_v54 = vpack.c.bf16 %v1808_v43, %v1801_v35  ;;  %v3312_v22 = vpack.c.bf16 %v1852_v56, %v1845_v10  ;;  %v4417_v45 = vpack.c.bf16 %v1822_v12, %v1815_v30 }
 0x1b1   : > { %3287 = vmatprep.subr.bf16.mxu0 %v3640_v13  ;;  %v4423_v53 = vpack.c.bf16 %v1836_v37, %v1829_v2  ;;  %v4429_v5 = vpack.c.bf16 %v1850_v38, %v1843_v26  ;;  %v3315_v8 = vpack.c.bf16 %v1866_v44, %v1859_v4  ;;  %v4435_v52 = vpack.c.bf16 %v1864_v36, %v1857_v15 }
 0x1b2   : > { %v4438_v25 = vand.u32 4294901760, %v4102_v51  ;;  %v4621_v46 = vpack.c.bf16 %v4273_v9, %v4283_v39  ;;  %v4623_v43 = vmov 0.0  }
 0x1b4   : > { %3334 = vmatpush3.bf16.xpose.msra.mxu1 %v3333_v29  ;;  %v1747_v6 = vsub.f32 %v4102_v51, %v4438_v25  ;;  %v4622_v51 = vpack.c.bf16 %v4298_v3, %v4304_v18 }
 0x1b5   : > { %3335 = vmatprep.subr.bf16.mxu1 %v3640_v13 }
 0x1b6   : > { %v1748_v19 = vand.u32 4294901760, %v1747_v6 }
 0x1b8   : > { %3289 = vmatpush3.bf16.xpose.msra.mxu0 %v4328_v32  ;;  %v1749_v57 = vsub.f32 %v1747_v6, %v1748_v19 }
 0x1b9   : > { %3290 = vmatprep.subr.bf16.mxu0 %v3640_v13 }
 0x1ba   : > { %v1750_v21 = vand.u32 4294901760, %v1749_v57 }
 0x1bc   : > { %3337 = vmatpush3.bf16.xpose.msra.mxu1 %v4621_v46 }
 0x1bd   : > { %3338 = vmatprep.subr.bf16.mxu1 %v3640_v13 }
 0x1c0   : > { %3292 = vmatpush3.bf16.xpose.msra.mxu0 %v4332_v49 }
 0x1c1   : > { %3293 = vmatprep.subr.bf16.mxu0 %v3640_v13 }
 0x1c4   : > { %3340 = vmatpush3.bf16.xpose.msra.mxu1 %v4622_v51 }
 0x1c5   : > { %3341 = vmatprep.subr.bf16.mxu1 %v3640_v13 }
 0x1c7   : > { %3068 = vmatmul.mubr.f32.vlgmr.msra.gmra.mrb[16].mxu0 %v1750_v21 }
 0x1c8   : > { %3295 = vmatpush3.bf16.xpose.msra.mxu0 %v3294_v40  ;;  %3102 = vmatprep.mubr.msk.f32.mxu0 %vm3641_vm1, %v4623_v43 }
 0x1c9   : > { %3296 = vmatprep.subr.bf16.mxu0 %v3640_v13 }
 0x1cb   : > { %3138 = vmatmul.mubr.f32.vlgmr.msra.gmra.mrb[16].mxu1 %v1747_v6 }
 0x1cc   : > { %3343 = vmatpush3.bf16.xpose.msra.mxu1 %v4107_v0  ;;  %3172 = vmatprep.mubr.msk.f32.mxu1 %vm3641_vm1, %v4623_v43 }
 0x1cd   : > { %3344 = vmatprep.subr.bf16.mxu1 %v3640_v13 }
 0x1d0   : > { %3298 = vmatpush3.bf16.xpose.msra.mxu0 %v3297_v60 }
 0x1d1   : > { %3299 = vmatprep.subr.bf16.mxu0 %v3640_v13 }
 0x1d4   : > { %3346 = vmatpush3.bf16.xpose.msra.mxu1 %v4152_v58 }
 0x1d5   : > { %3347 = vmatprep.subr.bf16.mxu1 %v3640_v13 }
 0x1d8   : > { %3301 = vmatpush3.bf16.xpose.msra.mxu0 %v3300_v48 }
 0x1d9   : > { %3302 = vmatprep.subr.bf16.mxu0 %v3640_v13 }
 0x1dc   : > { %3349 = vmatpush3.bf16.xpose.msra.mxu1 %v4226_v55 }
 0x1dd   : > { %3350 = vmatprep.subr.bf16.mxu1 %v3640_v13 }
 0x1e0   : > { %3304 = vmatpush3.bf16.xpose.msra.mxu0 %v3303_v16 }
 0x1e1   : > { %3305 = vmatprep.subr.bf16.mxu0 %v3640_v13 }
 0x1e4   : > { %3352 = vmatpush3.bf16.xpose.msra.mxu1 %v4281_v28 }
 0x1e5   : > { %3353 = vmatprep.subr.bf16.mxu1 %v3640_v13 }
 0x1e8   : > { %3307 = vmatpush3.bf16.xpose.msra.mxu0 %v3306_v31 }
 0x1e9   : > { %3308 = vmatprep.subr.bf16.mxu0 %v3640_v13 }
 0x1ec   : > { %3355 = vmatpush3.bf16.xpose.msra.mxu1 %v4311_v61 }
 0x1ed   : > { %3356 = vmatprep.subr.bf16.mxu1 %v3640_v13 }
 0x1f0   : > { %3310 = vmatpush3.bf16.xpose.msra.mxu0 %v3309_v14 }
 0x1f1   : > { %3311 = vmatprep.subr.bf16.mxu0 %v3640_v13 }
 0x1f4   : > { %3358 = vmatpush3.bf16.xpose.msra.mxu1 %v4322_v11 }
 0x1f5   : > { %3359 = vmatprep.subr.bf16.mxu1 %v3640_v13 }
 0x1f8   : > { %3313 = vmatpush3.bf16.xpose.msra.mxu0 %v3312_v22 }
 0x1f9   : > { %3314 = vmatprep.subr.bf16.mxu0 %v3640_v13 }
 0x1fc   : > { %3361 = vmatpush3.bf16.xpose.msra.mxu1 %v4328_v32 }
 0x1fd   : > { %3362 = vmatprep.subr.bf16.mxu1 %v3640_v13 }
 0x200   : > { %3316 = vmatpush3.bf16.xpose.msra.mxu0 %v3315_v8 }
 0x204   : > { %3364 = vmatpush3.bf16.xpose.msra.mxu1 %v4332_v49 }
 0x205   : > { %3365 = vmatprep.subr.bf16.mxu1 %v3640_v13 }
 0x207   : > { %3103 = vmatmul.mubr.f32.vlgmr.msra.gmra.mrb[16].mxu0 %v4438_v25 }
 0x20b   : > { %3173 = vmatmul.mubr.f32.vlgmr.msra.gmra.mrb[16].mxu1 %v1748_v19 }
 0x20c   : > { %3367 = vmatpush3.bf16.xpose.msra.mxu1 %v4391_v47  ;;  %3207 = vmatprep.mubr.msk.f32.mxu1 %vm3641_vm1, %v4623_v43 }
 0x20d   : > { %3368 = vmatprep.subr.bf16.mxu1 %v3640_v13 }
 0x211   : > { %v2335_v62 = vpop.xlane.xlu0 %2334 }
 0x212   : > { %2380 = vst.msk [vmem:[%s4491_s28 + $0x8] sm:$0xff] %vm2378_vm4, %v2335_v62 }
 0x214   : > { %3370 = vmatpush3.bf16.xpose.msra.mxu1 %v4397_v1 }
 0x215   : > { %3371 = vmatprep.subr.bf16.mxu1 %v3640_v13  ;;  %v2332_v34 = vpop.xlane.xlu0 %2331 }
 0x216   : > { %2379 = vst.msk [vmem:[%s4491_s28] sm:$0xff] %vm2378_vm4, %v2332_v34 }
 0x217   : > { %v2341_v35 = vpop.xlane.xlu1 %2340 }
 0x218   : > { %2382 = vst.msk [vmem:[%s4491_s28 + $0x18] sm:$0xff] %vm2378_vm4, %v2341_v35 }
 0x21b   : > { %v2338_v12 = vpop.xlane.xlu1 %2337 }
 0x21c   : > { %3373 = vmatpush3.bf16.xpose.msra.mxu1 %v4404_v41  ;;  %2381 = vst.msk [vmem:[%s4491_s28 + $0x10] sm:$0xff] %vm2378_vm4, %v2338_v12 }
 0x21d   : > { %3374 = vmatprep.subr.bf16.mxu1 %v3640_v13  ;;  %v2344_v30 = vpop.xlane.xlu0 %2343 }
 0x21e   : > { %2383 = vst.msk [vmem:[%s4491_s28 + $0x20] sm:$0xff] %vm2378_vm4, %v2344_v30 }
 0x21f   : > { %v2347_v33 = vpop.xlane.xlu1 %2346 }
 0x220   : > { %2384 = vst.msk [vmem:[%s4491_s28 + $0x28] sm:$0xff] %vm2378_vm4, %v2347_v33 }
 0x221   : > { %v2350_v27 = vpop.xlane.xlu0 %2349 }
 0x222   : > { %2385 = vst.msk [vmem:[%s4491_s28 + $0x30] sm:$0xff] %vm2378_vm4, %v2350_v27 }
 0x224   : > { %3376 = vmatpush3.bf16.xpose.msra.mxu1 %v4410_v54 }
 0x225   : > { %3377 = vmatprep.subr.bf16.mxu1 %v3640_v13  ;;  %v2353_v37 = vpop.xlane.xlu1 %2352  ;;  %v2356_v2 = vpop.xlane.xlu0 %2355 }
 0x226   : > { %2386 = vst.msk [vmem:[%s4491_s28 + $0x38] sm:$0xff] %vm2378_vm4, %v2353_v37  ;;  %2387 = vst.msk [vmem:[%s4491_s28 + $0x40] sm:$0xff] %vm2378_vm4, %v2356_v2 }
 0x229   : > { %v2359_v9 = vpop.xlane.xlu1 %2358 }
 0x22a   : > { %2388 = vst.msk [vmem:[%s4491_s28 + $0x48] sm:$0xff] %vm2378_vm4, %v2359_v9  ;;  %v2362_v39 = vpop.xlane.xlu0 %2361 }
 0x22b   : > { %2389 = vst.msk [vmem:[%s4491_s28 + $0x50] sm:$0xff] %vm2378_vm4, %v2362_v39 }
 0x22c   : > { %3379 = vmatpush3.bf16.xpose.msra.mxu1 %v4417_v45 }
 0x22d   : > { %3380 = vmatprep.subr.bf16.mxu1 %v3640_v13 }
 0x22e   : > { %v2365_v38 = vpop.xlane.xlu1 %2364 }
 0x22f   : > { %2390 = vst.msk [vmem:[%s4491_s28 + $0x58] sm:$0xff] %vm2378_vm4, %v2365_v38  ;;  %v2368_v26 = vpop.xlane.xlu0 %2367 }
 0x230   : > { %2391 = vst.msk [vmem:[%s4491_s28 + $0x60] sm:$0xff] %vm2378_vm4, %v2368_v26 }
 0x232   : > { %v2371_v3 = vpop.xlane.xlu1 %2370 }
 0x233   : > { %2392 = vst.msk [vmem:[%s4491_s28 + $0x68] sm:$0xff] %vm2378_vm4, %v2371_v3  ;;  %v2374_v18 = vpop.xlane.xlu0 %2373 }
 0x234   : > { %2393 = vst.msk [vmem:[%s4491_s28 + $0x70] sm:$0xff] %vm2378_vm4, %v2374_v18  ;;  %3382 = vmatpush3.bf16.xpose.msra.mxu1 %v4423_v53 }
 0x235   : > { %3383 = vmatprep.subr.bf16.mxu1 %v3640_v13 }
 0x236   : > { %v2377_v36 = vpop.xlane.xlu1 %2376 }
 0x237   : > { %2394 = vst.msk [vmem:[%s4491_s28 + $0x78] sm:$0xff] %vm2378_vm4, %v2377_v36 }
 0x23c   : > { %3385 = vmatpush3.bf16.xpose.msra.mxu1 %v4429_v5 }
 0x23d   : > { %3386 = vmatprep.subr.bf16.mxu1 %v3640_v13 }
 0x244   : > { %3388 = vmatpush3.bf16.xpose.msra.mxu1 %v4435_v52 }
 0x245   : > { %3389 = vmatprep.subr.bf16.mxu1 %v3640_v13 }
 0x24b   : > { %3208 = vmatmul.mubr.f32.vlgmr.msra.gmra.mrb[16].mxu1 %v4438_v25 }
 0x24c   : > { %3391 = vmatpush3.bf16.xpose.msra.mxu1 %v4107_v0  ;;  %3242 = vmatprep.mubr.msk.f32.mxu1 %vm3641_vm1, %v4623_v43 }
 0x24d   : > { %3392 = vmatprep.subr.bf16.mxu1 %v3640_v13 }
 0x254   : > { %3394 = vmatpush3.bf16.xpose.msra.mxu1 %v4152_v58 }
 0x255   : > { %3395 = vmatprep.subr.bf16.mxu1 %v3640_v13 }
 0x25c   : > { %3397 = vmatpush3.bf16.xpose.msra.mxu1 %v4226_v55 }
 0x25d   : > { %3398 = vmatprep.subr.bf16.mxu1 %v3640_v13 }
 0x264   : > { %3400 = vmatpush3.bf16.xpose.msra.mxu1 %v4281_v28 }
 0x265   : > { %3401 = vmatprep.subr.bf16.mxu1 %v3640_v13 }
 0x26c   : > { %3403 = vmatpush3.bf16.xpose.msra.mxu1 %v4311_v61 }
 0x26d   : > { %3404 = vmatprep.subr.bf16.mxu1 %v3640_v13 }
 0x274   : > { %3406 = vmatpush3.bf16.xpose.msra.mxu1 %v4322_v11 }
 0x275   : > { %3407 = vmatprep.subr.bf16.mxu1 %v3640_v13 }
 0x27c   : > { %3409 = vmatpush3.bf16.xpose.msra.mxu1 %v4328_v32 }
 0x27d   : > { %3410 = vmatprep.subr.bf16.mxu1 %v3640_v13 }
 0x284   : > { %3412 = vmatpush3.bf16.xpose.msra.mxu1 %v4332_v49 }
 0x28b   : > { %3243 = vmatmul.mubr.f32.vlgmr.msra.gmra.mrb[16].mxu1 %v4438_v25 }
 0x2da   : > { %v1903_v0 = vpop.f32.mrb[16].mxu0 }
 0x2db   : > { %v3104_v58 = vpop.f32.mrb[17].mxu0 }
 0x35e   : > { %v2302_v55 = vpop.f32.mrb[16].mxu1 }
 0x35f   : > { %v3429_v28 = vadd.f32 %v2302_v55, %v1903_v0  ;;  %v3244_v61 = vpop.f32.mrb[17].mxu1 }
 0x361   : > { %2306 = vst [vmem:[%s311_s8] sm:$0x1] %v3429_v28 }
 0x362   : > { %3573 = shalt.err (!%p3570_p5)
}
 0x363   : > { %s3574_s20 = scalar_lea.hbm %s4563_s15, 16  ;;  %s3578_s13 = scalar_lea.hbm %s4615_s5, 32 }
 0x364   : > { %p3575_p6 = scmp.ne.s32.totalorder %s4563_s15, %s3574_s20  ;;  %p3579_p10 = scmp.lt.u32.totalorder %s4563_s15, %s4615_s5 }
 0x365   : > { %p3580_p11 = scmp.lt.u32.totalorder %s3578_s13, %s3574_s20  ;;  %p3582_p13 = scmp.lt.u32.totalorder %s3574_s20, %s4563_s15 }
 0x366   : > { %p3576_p7 = pnand %p3575_p6, %p3719_p4 }
 0x367   : > { %p3581_p12 = por %p3580_p11, %p3579_p10 }
 0x368   : > { %p3577_p9 = pneg %p3576_p7 }
 0x369   : > { %p3583_p0 = por %p3582_p13, %p3581_p12 }
 0x36b   : > { %p3584_p1 = pnand %p3583_p0, %p3577_p9 }
 0x36d   : > { %3587 = shalt.err (!%p3584_p1)
}
 0x36e   : > { %3502 = dma.vmem_to_hbm [thread:$0]  (%p3719_p4), %s4565_s11, 16, %s4563_s15, %s2405_s16  }
 0x36f PF: > { %p3508_p2 = scmp.ge.s32.totalorder %s3638_s26, 2  ;;  %s2459_s12 = sand.u32 1, %s3618_s21  }
 0x370   : > { %s2460_s14 = scalar_lea.sflag [#allocation3], %s2459_s12 }
 0x371   : > { %p3505_p3 = pnand %p3508_p2, %p3726_p8 }
 0x373   : > { %3613 = dma.done.wait (!%p3505_p3), %s2460_s14, 16  }
 0x374   : > { %3615 = vsyncadd (!%p3505_p3), %s2460_s14, 4294967280  ;;  %s20_s26 = sadd.s32 1, %s3638_s26   ;;  %s4624_s21 = smov %s3622_s22 }
 0x375   : > { %p17_p5 = scmp.ge.s32.totalorder %s20_s26, 4   ;;  %s4625_s22 = smov %s3626_s23 }
 0x376   : > { %s4626_s23 = smov %s3732_s10  ;;  %s4627_s24 = smov %s3634_s25 }
 0x377   : > { %s4628_s25 = smov %s4630_s29  ;;  %19 = sbr.rel (!%p17_p5) target bundleno = 4 (0x4), region = 104 }
 0x37e   :  { %2476 = vsyncpa [#allocation3], 1 }
 0x37f   :  { %2478 = vsyncpa [#allocation3 + $0x1], 1 }

</bundles_post_ra>
